<compile_context>
chip_gen: v5e
topology: v5e:2x2
jax: 0.10.0
libtpu: 0.0.40
codegen_flags: <defaults>
</compile_context>

<pallas_src>
import math
import functools

import jax
import jax.numpy as jnp
from jax.experimental import pallas as pl
from jax.experimental.pallas import tpu as pltpu


def _linformer_kernel(x_ref, wqt_ref, bq_ref, wkt_ref, bk_ref, wvt_ref, bv_ref,
                      pw_ref, o_ref, *, num_head):
    # x_ref  : (B, S, F)   input
    # wqt/wkt/wvt : (F, F) Linear weights pre-transposed (so q = x @ WqT + bq)
    # bq/bk/bv    : (1, F) biases
    # pw_ref : (S, E)      layer-wise shared Linformer projection
    # o_ref  : (B, S, F)   output
    B, S, F = x_ref.shape
    E = pw_ref.shape[1]
    H = num_head
    hd = F // H
    inv_sqrt_d = 1.0 / math.sqrt(hd)

    # --- QKV for all batches in one 2-D matmul each (M = B*S, lane-dense N = F) ---
    x2 = x_ref[...].reshape(B * S, F)
    q2 = jnp.dot(x2, wqt_ref[...], preferred_element_type=jnp.float32) + bq_ref[...]
    k2 = jnp.dot(x2, wkt_ref[...], preferred_element_type=jnp.float32) + bk_ref[...]
    v2 = jnp.dot(x2, wvt_ref[...], preferred_element_type=jnp.float32) + bv_ref[...]
    pw = pw_ref[...]                                        # (S, E)

    # Batch is folded into this single kernel invocation (static unroll, B tiny):
    # no grid steps, no per-step DMA bookkeeping.
    for b in range(B):
        rows = slice(b * S, (b + 1) * S)                    # sublane-aligned (S % 8 == 0)

        # Transposed-domain per-batch activations (F, S): with F on the sublane axis
        # the head split F -> (H, hd) below is a sublane-aligned (cheap) reshape,
        # so no per-head lane slicing is ever needed.
        qT = q2[rows].T                                     # (F, S)  2-D XLU transpose
        kT = k2[rows].T                                     # (F, S)
        vT = v2[rows].T                                     # (F, S)

        # Linformer projection along the sequence axis, all heads at once.
        kp = jnp.dot(kT, pw, preferred_element_type=jnp.float32)    # (F, E)
        vp = jnp.dot(vT, pw, preferred_element_type=jnp.float32)    # (F, E)
        # TODO(synk): training-mode value dropout (pltpu.prng_* Bernoulli mask) not
        # implemented; value_drop_prob is treated as 0.0 (eval mode).

        qh = qT.reshape(H, hd, S)                           # (H, hd, S)
        kph = kp.reshape(H, hd, E)                          # (H, hd, E)
        vph = vp.reshape(H, hd, E)                          # (H, hd, E)
        kpt = jnp.swapaxes(kph, 1, 2)                       # (H, E, hd) minor-dim swap (tiny)

        # Head-batched scores (transposed orientation): sT[h,e,n] = sum_d kpt[h,e,d]*qh[h,d,n]
        sT = jnp.einsum('hed,hdn->hen', kpt, qh,
                        preferred_element_type=jnp.float32) * inv_sqrt_d   # (H, E, S)

        # One fused softmax over the Linformer axis E (axis=1) for all heads.
        sT = sT - jnp.max(sT, axis=1, keepdims=True)
        pT = jnp.exp(sT)
        pT = pT / jnp.sum(pT, axis=1, keepdims=True)        # exact division (no approx recip)

        # Head-batched attention output: oT[h,d,n] = sum_e vph[h,d,e] * pT[h,e,n]
        oT = jnp.einsum('hde,hen->hdn', vph, pT,
                        preferred_element_type=jnp.float32)                # (H, hd, S)

        # (H, hd, S) -> (F, S) is a free leading-dim merge; one 2-D transpose produces
        # the natural (S, F) slab, stored at a leading batch index (full-tile store).
        o_ref[b] = oT.reshape(F, S).T.astype(o_ref.dtype)


def linformer_mhsa_pallas(x, wq, wk, wv, bq, bk, bv, proj_w, num_head):
    """x: (B,S,F); wq/wk/wv: (F,F) torch (out,in) layout; bq/bk/bv: (F,);
    proj_w: (S,E).  Returns (B,S,F)."""
    B, S, F = x.shape
    kernel = functools.partial(_linformer_kernel, num_head=num_head)
    vmem = lambda: pl.BlockSpec(memory_space=pltpu.MemorySpace.VMEM)

    return pl.pallas_call(
        kernel,
        out_shape=jax.ShapeDtypeStruct((B, S, F), x.dtype),
        in_specs=[vmem() for _ in range(8)],
        out_specs=vmem(),
    )(x,
      wq.T, bq.reshape(1, F),
      wk.T, bk.reshape(1, F),
      wv.T, bv.reshape(1, F),
      proj_w)


def _xavier_uniform(key, shape):
    fan_out, fan_in = shape
    a = math.sqrt(6.0 / (fan_in + fan_out))
    return jax.random.uniform(key, shape, jnp.float32, minval=-a, maxval=a)


def _reference(x, wq, wk, wv, bq, bk, bv, proj_w, num_head):
    B, S, F = x.shape
    hd = F // num_head
    q = x @ wq.T + bq
    k = x @ wk.T + bk
    v = x @ wv.T + bv

    def split(t):
        return t.reshape(B, S, num_head, hd).transpose(0, 2, 1, 3)

    qh, kh, vh = split(q), split(k), split(v)
    kp = jnp.einsum('bhnd,ne->bhed', kh, proj_w)
    vp = jnp.einsum('bhnd,nf->bhfd', vh, proj_w)
    s = jnp.einsum('bhnd,bhed->bhne', qh, kp) / math.sqrt(hd)
    p = jax.nn.softmax(s, axis=-1)
    o = jnp.einsum('bhne,bhed->bhnd', p, vp)
    return o.transpose(0, 2, 1, 3).reshape(B, S, F)


if __name__ == "__main__":
    # module config
    seq_len, feat_dim, num_head, proj_dim = 16, 32, 4, 8
    batch = 2

    key = jax.random.PRNGKey(0)
    kx, kproj, kq, kk, kv = jax.random.split(key, 5)

    x = jax.random.normal(kx, (batch, seq_len, feat_dim), jnp.float32)
    proj_weight_all = jax.random.normal(kproj, (seq_len, proj_dim), jnp.float32) * 0.1

    # deterministic parameter init (xavier_uniform weights, zero biases — matches
    # the module's reset_parameters)
    wq = _xavier_uniform(kq, (feat_dim, feat_dim))
    wk = _xavier_uniform(kk, (feat_dim, feat_dim))
    wv = _xavier_uniform(kv, (feat_dim, feat_dim))
    bq = jnp.zeros((feat_dim,), jnp.float32)
    bk = jnp.zeros((feat_dim,), jnp.float32)
    bv = jnp.zeros((feat_dim,), jnp.float32)

    out = linformer_mhsa_pallas(x, wq, wk, wv, bq, bk, bv, proj_weight_all, num_head)
    out = jax.block_until_ready(out)

    ref = _reference(x, wq, wk, wv, bq, bk, bv, proj_weight_all, num_head)
    assert out.shape == (batch, seq_len, feat_dim)
    err = float(jnp.max(jnp.abs(out - ref)))
    # exact-division softmax -> tight tolerance (covers f32 MXU accumulation-order diffs)
    assert jnp.allclose(out, ref, atol=1e-4, rtol=1e-4), err

    print("KERNEL_OK")
</pallas_src>

<mosaic_0001>
module attributes {stable_mosaic.version = 11 : i64} {
  func.func @_linformer_kernel(%arg0: memref<2x16x32xf32, #tpu.memory_space<vmem>>, %arg1: memref<32x32xf32, #tpu.memory_space<vmem>>, %arg2: memref<1x32xf32, #tpu.memory_space<vmem>>, %arg3: memref<32x32xf32, #tpu.memory_space<vmem>>, %arg4: memref<1x32xf32, #tpu.memory_space<vmem>>, %arg5: memref<32x32xf32, #tpu.memory_space<vmem>>, %arg6: memref<1x32xf32, #tpu.memory_space<vmem>>, %arg7: memref<16x8xf32, #tpu.memory_space<vmem>>, %arg8: memref<2x16x32xf32, #tpu.memory_space<vmem>>) attributes {dimension_semantics = [], scalar_prefetch = 0 : i64, scratch_operands = 0 : i64, tpu.core_type = #tpu.core_type<tc>} {
    %c0 = arith.constant 0 : index
    %c0_0 = arith.constant 0 : index
    %c0_1 = arith.constant 0 : index
    %0 = vector.load %arg0[%c0, %c0_0, %c0_1] : memref<2x16x32xf32, #tpu.memory_space<vmem>>, vector<2x16x32xf32>
    %1 = vector.shape_cast %0 : vector<2x16x32xf32> to vector<32x32xf32>
    %c0_2 = arith.constant 0 : index
    %c0_3 = arith.constant 0 : index
    %2 = vector.load %arg1[%c0_2, %c0_3] : memref<32x32xf32, #tpu.memory_space<vmem>>, vector<32x32xf32>
    %cst = arith.constant dense<0.000000e+00> : vector<32x32xf32>
    %3 = tpu.matmul %1, %2, %cst {dimension_numbers = #tpu.dot_dimension_numbers<[1], [0], [0], [1], [0, 0, 1, 1], [], []>} : vector<32x32xf32>, vector<32x32xf32>, vector<32x32xf32> -> vector<32x32xf32>
    %c0_4 = arith.constant 0 : index
    %c0_5 = arith.constant 0 : index
    %4 = vector.load %arg2[%c0_4, %c0_5] : memref<1x32xf32, #tpu.memory_space<vmem>>, vector<1x32xf32>
    %5 = vector.broadcast %4 : vector<1x32xf32> to vector<32x32xf32>
    %6 = arith.addf %3, %5 : vector<32x32xf32>
    %c0_6 = arith.constant 0 : index
    %c0_7 = arith.constant 0 : index
    %7 = vector.load %arg3[%c0_6, %c0_7] : memref<32x32xf32, #tpu.memory_space<vmem>>, vector<32x32xf32>
    %cst_8 = arith.constant dense<0.000000e+00> : vector<32x32xf32>
    %8 = tpu.matmul %1, %7, %cst_8 {dimension_numbers = #tpu.dot_dimension_numbers<[1], [0], [0], [1], [0, 0, 1, 1], [], []>} : vector<32x32xf32>, vector<32x32xf32>, vector<32x32xf32> -> vector<32x32xf32>
    %c0_9 = arith.constant 0 : index
    %c0_10 = arith.constant 0 : index
    %9 = vector.load %arg4[%c0_9, %c0_10] : memref<1x32xf32, #tpu.memory_space<vmem>>, vector<1x32xf32>
    %10 = vector.broadcast %9 : vector<1x32xf32> to vector<32x32xf32>
    %11 = arith.addf %8, %10 : vector<32x32xf32>
    %c0_11 = arith.constant 0 : index
    %c0_12 = arith.constant 0 : index
    %12 = vector.load %arg5[%c0_11, %c0_12] : memref<32x32xf32, #tpu.memory_space<vmem>>, vector<32x32xf32>
    %cst_13 = arith.constant dense<0.000000e+00> : vector<32x32xf32>
    %13 = tpu.matmul %1, %12, %cst_13 {dimension_numbers = #tpu.dot_dimension_numbers<[1], [0], [0], [1], [0, 0, 1, 1], [], []>} : vector<32x32xf32>, vector<32x32xf32>, vector<32x32xf32> -> vector<32x32xf32>
    %c0_14 = arith.constant 0 : index
    %c0_15 = arith.constant 0 : index
    %14 = vector.load %arg6[%c0_14, %c0_15] : memref<1x32xf32, #tpu.memory_space<vmem>>, vector<1x32xf32>
    %15 = vector.broadcast %14 : vector<1x32xf32> to vector<32x32xf32>
    %16 = arith.addf %13, %15 : vector<32x32xf32>
    %c0_16 = arith.constant 0 : index
    %c0_17 = arith.constant 0 : index
    %17 = vector.load %arg7[%c0_16, %c0_17] : memref<16x8xf32, #tpu.memory_space<vmem>>, vector<16x8xf32>
    %18 = vector.extract_strided_slice %6 {offsets = [0, 0], sizes = [16, 32], strides = [1, 1]} : vector<32x32xf32> to vector<16x32xf32>
    %19 = tpu.transpose %18, [1, 0] : vector<16x32xf32> -> vector<32x16xf32>
    %20 = vector.extract_strided_slice %11 {offsets = [0, 0], sizes = [16, 32], strides = [1, 1]} : vector<32x32xf32> to vector<16x32xf32>
    %21 = tpu.transpose %20, [1, 0] : vector<16x32xf32> -> vector<32x16xf32>
    %22 = vector.extract_strided_slice %16 {offsets = [0, 0], sizes = [16, 32], strides = [1, 1]} : vector<32x32xf32> to vector<16x32xf32>
    %23 = tpu.transpose %22, [1, 0] : vector<16x32xf32> -> vector<32x16xf32>
    %cst_18 = arith.constant dense<0.000000e+00> : vector<32x8xf32>
    %24 = tpu.matmul %21, %17, %cst_18 {dimension_numbers = #tpu.dot_dimension_numbers<[1], [0], [0], [1], [0, 0, 1, 1], [], []>} : vector<32x16xf32>, vector<16x8xf32>, vector<32x8xf32> -> vector<32x8xf32>
    %cst_19 = arith.constant dense<0.000000e+00> : vector<32x8xf32>
    %25 = tpu.matmul %23, %17, %cst_19 {dimension_numbers = #tpu.dot_dimension_numbers<[1], [0], [0], [1], [0, 0, 1, 1], [], []>} : vector<32x16xf32>, vector<16x8xf32>, vector<32x8xf32> -> vector<32x8xf32>
    %26 = vector.shape_cast %19 : vector<32x16xf32> to vector<4x8x16xf32>
    %27 = vector.shape_cast %24 : vector<32x8xf32> to vector<4x8x8xf32>
    %28 = vector.shape_cast %25 : vector<32x8xf32> to vector<4x8x8xf32>
    %29 = tpu.transpose %27, [0, 2, 1] : vector<4x8x8xf32> -> vector<4x8x8xf32>
    "tpu.trace_start"() <{level = 10 : i32, message = "hed,hdn->hen"}> : () -> ()
    %cst_20 = arith.constant dense<0.000000e+00> : vector<4x8x16xf32>
    %30 = tpu.matmul %29, %26, %cst_20 {dimension_numbers = #tpu.dot_dimension_numbers<[2], [1], [1], [2], [0, 0, 0, 1, 1, 2], [0], [0]>} : vector<4x8x8xf32>, vector<4x8x16xf32>, vector<4x8x16xf32> -> vector<4x8x16xf32>
    "tpu.trace_stop"() : () -> ()
    %cst_21 = arith.constant 0.353553385 : f32
    %31 = vector.broadcast %cst_21 : f32 to vector<4x8x16xf32>
    %32 = arith.mulf %30, %31 : vector<4x8x16xf32>
    %cst_22 = arith.constant dense<0xFF800000> : vector<4x16xf32>
    %33 = vector.multi_reduction <maximumf>, %32, %cst_22 [1] : vector<4x8x16xf32> to vector<4x16xf32>
    %34 = vector.shape_cast %33 : vector<4x16xf32> to vector<4x1x16xf32>
    %35 = vector.broadcast %34 : vector<4x1x16xf32> to vector<4x8x16xf32>
    %36 = arith.subf %32, %35 : vector<4x8x16xf32>
    %37 = math.exp %36 : vector<4x8x16xf32>
    %cst_23 = arith.constant dense<0.000000e+00> : vector<4x16xf32>
    %38 = vector.multi_reduction <add>, %37, %cst_23 [1] : vector<4x8x16xf32> to vector<4x16xf32>
    %39 = vector.shape_cast %38 : vector<4x16xf32> to vector<4x1x16xf32>
    %40 = vector.broadcast %39 : vector<4x1x16xf32> to vector<4x8x16xf32>
    %41 = arith.divf %37, %40 : vector<4x8x16xf32>
    "tpu.trace_start"() <{level = 10 : i32, message = "hde,hen->hdn"}> : () -> ()
    %cst_24 = arith.constant dense<0.000000e+00> : vector<4x8x16xf32>
    %42 = tpu.matmul %28, %41, %cst_24 {dimension_numbers = #tpu.dot_dimension_numbers<[2], [1], [1], [2], [0, 0, 0, 1, 1, 2], [0], [0]>} : vector<4x8x8xf32>, vector<4x8x16xf32>, vector<4x8x16xf32> -> vector<4x8x16xf32>
    "tpu.trace_stop"() : () -> ()
    %43 = vector.shape_cast %42 : vector<4x8x16xf32> to vector<32x16xf32>
    %44 = tpu.transpose %43, [1, 0] : vector<32x16xf32> -> vector<16x32xf32>
    %c0_25 = arith.constant 0 : index
    %c0_26 = arith.constant 0 : index
    %c0_27 = arith.constant 0 : index
    %45 = vector.load %arg8[%c0_25, %c0_26, %c0_27] : memref<2x16x32xf32, #tpu.memory_space<vmem>>, vector<1x16x32xf32>
    %46 = vector.shape_cast %45 : vector<1x16x32xf32> to vector<16x32xf32>
    %47 = vector.shape_cast %44 : vector<16x32xf32> to vector<1x16x32xf32>
    tpu.vector_store %arg8[%c0_25, %c0_26, %c0_27], %47 {strides = array<i32>} : memref<2x16x32xf32, #tpu.memory_space<vmem>>, vector<1x16x32xf32>,
    %48 = vector.extract_strided_slice %6 {offsets = [16, 0], sizes = [16, 32], strides = [1, 1]} : vector<32x32xf32> to vector<16x32xf32>
    %49 = tpu.transpose %48, [1, 0] : vector<16x32xf32> -> vector<32x16xf32>
    %50 = vector.extract_strided_slice %11 {offsets = [16, 0], sizes = [16, 32], strides = [1, 1]} : vector<32x32xf32> to vector<16x32xf32>
    %51 = tpu.transpose %50, [1, 0] : vector<16x32xf32> -> vector<32x16xf32>
    %52 = vector.extract_strided_slice %16 {offsets = [16, 0], sizes = [16, 32], strides = [1, 1]} : vector<32x32xf32> to vector<16x32xf32>
    %53 = tpu.transpose %52, [1, 0] : vector<16x32xf32> -> vector<32x16xf32>
    %cst_28 = arith.constant dense<0.000000e+00> : vector<32x8xf32>
    %54 = tpu.matmul %51, %17, %cst_28 {dimension_numbers = #tpu.dot_dimension_numbers<[1], [0], [0], [1], [0, 0, 1, 1], [], []>} : vector<32x16xf32>, vector<16x8xf32>, vector<32x8xf32> -> vector<32x8xf32>
    %cst_29 = arith.constant dense<0.000000e+00> : vector<32x8xf32>
    %55 = tpu.matmul %53, %17, %cst_29 {dimension_numbers = #tpu.dot_dimension_numbers<[1], [0], [0], [1], [0, 0, 1, 1], [], []>} : vector<32x16xf32>, vector<16x8xf32>, vector<32x8xf32> -> vector<32x8xf32>
    %56 = vector.shape_cast %49 : vector<32x16xf32> to vector<4x8x16xf32>
    %57 = vector.shape_cast %54 : vector<32x8xf32> to vector<4x8x8xf32>
    %58 = vector.shape_cast %55 : vector<32x8xf32> to vector<4x8x8xf32>
    %59 = tpu.transpose %57, [0, 2, 1] : vector<4x8x8xf32> -> vector<4x8x8xf32>
    "tpu.trace_start"() <{level = 10 : i32, message = "hed,hdn->hen"}> : () -> ()
    %cst_30 = arith.constant dense<0.000000e+00> : vector<4x8x16xf32>
    %60 = tpu.matmul %59, %56, %cst_30 {dimension_numbers = #tpu.dot_dimension_numbers<[2], [1], [1], [2], [0, 0, 0, 1, 1, 2], [0], [0]>} : vector<4x8x8xf32>, vector<4x8x16xf32>, vector<4x8x16xf32> -> vector<4x8x16xf32>
    "tpu.trace_stop"() : () -> ()
    %cst_31 = arith.constant 0.353553385 : f32
    %61 = vector.broadcast %cst_31 : f32 to vector<4x8x16xf32>
    %62 = arith.mulf %60, %61 : vector<4x8x16xf32>
    %cst_32 = arith.constant dense<0xFF800000> : vector<4x16xf32>
    %63 = vector.multi_reduction <maximumf>, %62, %cst_32 [1] : vector<4x8x16xf32> to vector<4x16xf32>
    %64 = vector.shape_cast %63 : vector<4x16xf32> to vector<4x1x16xf32>
    %65 = vector.broadcast %64 : vector<4x1x16xf32> to vector<4x8x16xf32>
    %66 = arith.subf %62, %65 : vector<4x8x16xf32>
    %67 = math.exp %66 : vector<4x8x16xf32>
    %cst_33 = arith.constant dense<0.000000e+00> : vector<4x16xf32>
    %68 = vector.multi_reduction <add>, %67, %cst_33 [1] : vector<4x8x16xf32> to vector<4x16xf32>
    %69 = vector.shape_cast %68 : vector<4x16xf32> to vector<4x1x16xf32>
    %70 = vector.broadcast %69 : vector<4x1x16xf32> to vector<4x8x16xf32>
    %71 = arith.divf %67, %70 : vector<4x8x16xf32>
    "tpu.trace_start"() <{level = 10 : i32, message = "hde,hen->hdn"}> : () -> ()
    %cst_34 = arith.constant dense<0.000000e+00> : vector<4x8x16xf32>
    %72 = tpu.matmul %58, %71, %cst_34 {dimension_numbers = #tpu.dot_dimension_numbers<[2], [1], [1], [2], [0, 0, 0, 1, 1, 2], [0], [0]>} : vector<4x8x8xf32>, vector<4x8x16xf32>, vector<4x8x16xf32> -> vector<4x8x16xf32>
    "tpu.trace_stop"() : () -> ()
    %73 = vector.shape_cast %72 : vector<4x8x16xf32> to vector<32x16xf32>
    %74 = tpu.transpose %73, [1, 0] : vector<32x16xf32> -> vector<16x32xf32>
    %c1 = arith.constant 1 : index
    %c0_35 = arith.constant 0 : index
    %c0_36 = arith.constant 0 : index
    %75 = vector.load %arg8[%c1, %c0_35, %c0_36] : memref<2x16x32xf32, #tpu.memory_space<vmem>>, vector<1x16x32xf32>
    %76 = vector.shape_cast %75 : vector<1x16x32xf32> to vector<16x32xf32>
    %77 = vector.shape_cast %74 : vector<16x32xf32> to vector<1x16x32xf32>
    tpu.vector_store %arg8[%c1, %c0_35, %c0_36], %77 {strides = array<i32>} : memref<2x16x32xf32, #tpu.memory_space<vmem>>, vector<1x16x32xf32>,
    return
  }
}

</mosaic_0001>

<bundles_post_ra>
// kernel: tpu_custom_call.1
= control target key start
LH: loop header
LB: loop body
LE: loop exit
PB: predicated region body
PF: predicated region fallthrough
CT: control target
= control target key end

     0   :  { %13 = vsyncpa [#allocation3], 0  ;;  %s1983_s0 = inlined_call_operand.hbm [shape: f32[2,16,32], index: 0, kind: input, shape index: {}]   ;;  %s1984_s1 = inlined_call_operand.hbm [shape: f32[32,32], index: 1, kind: input, shape index: {}]   ;;  %s1985_s2 = inlined_call_operand.vmem [shape: f32[1,32], index: 2, kind: input, shape index: {}]   ;;  %s1986_s3 = inlined_call_operand.hbm [shape: f32[32,32], index: 3, kind: input, shape index: {}]   ;;  %s1987_s4 = inlined_call_operand.vmem [shape: f32[1,32], index: 4, kind: input, shape index: {}]   ;;  %s1988_s5 = inlined_call_operand.hbm [shape: f32[32,32], index: 5, kind: input, shape index: {}]   ;;  %s1989_s6 = inlined_call_operand.vmem [shape: f32[1,32], index: 6, kind: input, shape index: {}]   ;;  %s1990_s7 = inlined_call_operand.vmem [shape: f32[16,8], index: 7, kind: input, shape index: {}]   ;;  %s1991_s8 = inlined_call_operand.hbm [shape: f32[2,16,32], index: 8, kind: output, shape index: {}]  }
   0x1   :  { %14 = vsyncpa [#allocation6], 0 }
   0x2   :  { %15 = vsyncpa [#allocation9], 0 }
   0x3   :  { %16 = vsyncpa [#allocation4], 0  ;;  %s34_s29 = sshll.u32 %s1984_s1, 4  ;;  %s1774_s30 = smov [#allocation5]   ;;  %s35_s29 = int_to_ptr.hbm [resolvable:$true] %s34_s29 }
   0x4   :  { %s36_s9 = sshll.u32 %s1774_s30, 4  ;;  %s21_s12 = sshll.u32 %s1983_s0, 4  ;;  %s37_s9 = int_to_ptr.vmem [resolvable:$true] %s36_s9  ;;  %s22_s12 = int_to_ptr.hbm [resolvable:$true] %s21_s12 }
   0x5   :  { %s1775_s13 = smov 128   ;;  %s1776_s14 = smov 8  }
   0x6   :  { %42 = dma.hbm_to_vmem [thread:$0]  %s35_s29, 512, %s37_s9, [#allocation6], %s1775_s13, %s1775_s13, %s1776_s14  }
   0x7   :  { %s1777_s15 = smov [#allocation2]   ;;  %s49_s1 = sshll.u32 %s1986_s3, 4  ;;  %s50_s1 = int_to_ptr.hbm [resolvable:$true] %s49_s1 }
   0x8   :  { %s23_s16 = sshll.u32 %s1777_s15, 4  ;;  %s64_s20 = sshll.u32 %s1988_s5, 4  ;;  %s24_s16 = int_to_ptr.vmem [resolvable:$true] %s23_s16  ;;  %s65_s20 = int_to_ptr.hbm [resolvable:$true] %s64_s20 }
   0x9   :  { %29 = dma.hbm_to_vmem [thread:$0]  %s22_s12, 512, %s24_s16, [#allocation3], %s1775_s13, %s1775_s13, %s1776_s14  }
   0xa   :  { %s1778_s21 = smov [#allocation7]   ;;  %s1779_s23 = smov [#allocation8]  }
   0xb   :  { %s51_s22 = sshll.u32 %s1778_s21, 4  ;;  %s66_s3 = sshll.u32 %s1779_s23, 4  ;;  %s52_s22 = int_to_ptr.vmem [resolvable:$true] %s51_s22  ;;  %s67_s3 = int_to_ptr.vmem [resolvable:$true] %s66_s3 }
   0xc   :  { %57 = dma.hbm_to_vmem [thread:$0]  %s50_s1, 512, %s52_s22, [#allocation6], %s1775_s13, %s1775_s13, %s1776_s14  }
   0xd   :  { %72 = dma.hbm_to_vmem [thread:$0]  %s65_s20, 512, %s67_s3, [#allocation9], %s1775_s13, %s1775_s13, %s1776_s14  }
   0xe   :  { %1766 = dma.done.wait [#allocation3], 512  }
   0xf   :  { %1767 = vsyncadd [#allocation3], 4294966784 }
  0x10   :  { %1768 = dma.done.wait [#allocation6], 1024  }
  0x11   :  { %1769 = vsyncadd [#allocation6], 4294966272 }
  0x12   :  { %1770 = dma.done.wait [#allocation9], 512  }
  0x13   :  { %1771 = vsyncadd [#allocation9], 4294966784  ;;  %v150_v0 = vld [vmem:[#allocation7 + $0x18] sm:$0xff]  ;;  %v149_v1 = vld [vmem:[#allocation7 + $0x10] sm:$0xff]  ;;  %vm105_vm0 = vcmask 261120   ;;  %vm319_vm1 = vcmask 130048  }
  0x14   :  { %167 = vmatpush.msra.mxu1 %v150_v0  ;;  %v148_v2 = vld [vmem:[#allocation7 + $0x8] sm:$0xff]  ;;  %v147_v3 = vld [vmem:[#allocation7] sm:$0xff]  ;;  %v100_v6 = vld [vmem:[#allocation5 + $0x18] sm:$0xff]  ;;  %vm530_vm2 = vcmask 64512   ;;  %s1544_s11 = sshll.u32 %s1991_s8, 4  ;;  %s1545_s11 = int_to_ptr.hbm [resolvable:$true] %s1544_s11 }
  0x15   :  { %v93_v4 = vld [vmem:[#allocation2] sm:$0xff]  ;;  %v94_v5 = vld [vmem:[#allocation2 + $0x8] sm:$0xff]  ;;  %v99_v7 = vld [vmem:[#allocation5 + $0x10] sm:$0xff]  ;;  %130 = vmatpush.msra.mxu0 %v100_v6 }
  0x16   :  { %168 = vmatpush.msra.mxu1 %v149_v1  ;;  %v1855_v8 = vld [vmem:[%s1990_s7 + $0x8] sm:$0xff]  ;;  %v1860_v9 = vld [vmem:[%s1990_s7] sm:$0xff]  ;;  %v187_v17 = vld [vmem:[#allocation8 + $0x18] sm:$0xff] }
  0x17   :  { %v98_v10 = vld [vmem:[#allocation5 + $0x8] sm:$0xff]  ;;  %346 = vmatpush.msra.mxu3 %v1855_v8  ;;  %131 = vmatpush.msra.mxu0 %v99_v7  ;;  %v97_v11 = vld [vmem:[#allocation5] sm:$0xff]  ;;  %v186_v18 = vld [vmem:[#allocation8 + $0x10] sm:$0xff] }
  0x18   :  { %169 = vmatpush.msra.mxu1 %v148_v2  ;;  %v1871_v12 = vld [vmem:[%s1987_s4] ss:$0 sm:$0xff]  ;;  %204 = vmatpush.msra.mxu2 %v187_v17  ;;  %v185_v19 = vld [vmem:[#allocation8 + $0x8] sm:$0xff]  ;;  %v95_v30 = vld [vmem:[#allocation2 + $0x10] sm:$0xff] }
  0x19   :  { %347 = vmatpush.msra.mxu3 %v1860_v9  ;;  %132 = vmatpush.msra.mxu0 %v98_v10  ;;  %v184_v20 = vld [vmem:[#allocation8] sm:$0xff]  ;;  %v96_v31 = vld [vmem:[#allocation2 + $0x18] sm:$0xff] }
  0x1a   :  { %170 = vmatpush.msra.mxu1 %v147_v3  ;;  %205 = vmatpush.msra.mxu2 %v186_v18  ;;  %v1880_v22 = vld [vmem:[%s1985_s2] ss:$0 sm:$0xff] }
  0x1b   :  { %1563 = vmatmul.msk.f32.vlgmr.msra.gmra.mxu1 %vm105_vm0, %v93_v4  ;;  %387 = vmatpush.msrb.mxu3 %v1855_v8  ;;  %v1897_v35 = vld [vmem:[%s1989_s6] ss:$0 sm:$0xff]  ;;  %s1780_s6 = smov [#allocation10]  }
  0x1c   :  { %133 = vmatpush.msra.mxu0 %v97_v11  ;;  %206 = vmatpush.msra.mxu2 %v185_v19  ;;  %s1542_s30 = sshll.u32 %s1780_s6, 4  ;;  %s1543_s30 = int_to_ptr.vmem [resolvable:$true] %s1542_s30 }
  0x1d   :  { %388 = vmatpush.msrb.mxu3 %v1860_v9  ;;  %1559 = vmatmul.msk.f32.vlgmr.msra.gmra.mxu0 %vm105_vm0, %v93_v4 }
  0x1e   :  { %207 = vmatpush.msra.mxu2 %v184_v20 }
  0x1f   :  { %1567 = vmatmul.msk.f32.vlgmr.msra.gmra.mxu2 %vm105_vm0, %v93_v4 }
  0x23   :  { %1564 = vmatmul.msk.f32.gmra.mxu1 %vm105_vm0, %v94_v5 }
  0x25   :  { %1560 = vmatmul.msk.f32.gmra.mxu0 %vm105_vm0, %v94_v5 }
  0x27   :  { %1568 = vmatmul.msk.f32.gmra.mxu2 %vm105_vm0, %v94_v5 }
  0x2b   :  { %1565 = vmatmul.msk.f32.gmra.mxu1 %vm105_vm0, %v95_v30 }
  0x2d   :  { %1561 = vmatmul.msk.f32.gmra.mxu0 %vm105_vm0, %v95_v30 }
  0x2f   :  { %1569 = vmatmul.msk.f32.gmra.mxu2 %vm105_vm0, %v95_v30 }
  0x33   :  { %1566 = vmatmul.msk.f32.gmra.mxu1 %vm105_vm0, %v96_v31 }
  0x35   :  { %1562 = vmatmul.msk.f32.gmra.mxu0 %vm105_vm0, %v96_v31 }
  0x37   :  { %1570 = vmatmul.msk.f32.gmra.mxu2 %vm105_vm0, %v96_v31 }
  0x98   :  { %v172_v13 = vpop.f32.mrf.mxu1 }
  0x99   :  { %v173_v14 = vadd.f32 %v1871_v12, %v172_v13 }
  0x9a   :  { %v135_v21 = vpop.f32.mrf.mxu0 }
  0x9b   :  { %255 = vxpose.xlu0.b32.start [1/2] (short) (narrow) %v173_v14, 32  ;;  %v136_v23 = vadd.f32 %v1880_v22, %v135_v21 }
  0x9d   :  { %223 = vxpose.xlu1.b32.start [1/2] (short) (narrow) %v136_v23, 32 }
  0xa0   :  { %v175_v15 = vpop.f32.mrf.mxu1 }
  0xa1   :  { %v176_v16 = vadd.f32 %v1871_v12, %v175_v15 }
  0xa2   :  { %v138_v25 = vpop.f32.mrf.mxu0  ;;  %v209_v34 = vpop.f32.mrf.mxu2 }
  0xa3   :  { %256 = vxpose.xlu0.b32.end [2/2] (short) (narrow) %v176_v16, 32  ;;  %v139_v26 = vadd.f32 %v1880_v22, %v138_v25  ;;  %v210_v36 = vadd.f32 %v1897_v35, %v209_v34 }
  0xa5   :  { %224 = vxpose.xlu1.b32.end [2/2] (short) (narrow) %v139_v26, 32 }
  0xa8   :  { %v178_v43 = vpop.f32.mrf.mxu1 }
  0xa9   :  { %v179_v44 = vadd.f32 %v1871_v12, %v178_v43 }
  0xaa   :  { %v212_v38 = vpop.f32.mrf.mxu2  ;;  %v141_v52 = vpop.f32.mrf.mxu0 }
  0xab   :  { %v213_v39 = vadd.f32 %v1897_v35, %v212_v38  ;;  %v142_v53 = vadd.f32 %v1880_v22, %v141_v52 }
  0xb0   :  { %v181_v45 = vpop.f32.mrf.mxu1 }
  0xb1   :  { %v182_v46 = vadd.f32 %v1871_v12, %v181_v45 }
  0xb2   :  { %v144_v55 = vpop.f32.mrf.mxu0 }
  0xb3   :  { %v145_v56 = vadd.f32 %v1880_v22, %v144_v55 }
 0x13f   :  { %v271_v24 = vpop.trf.xlu0 }
 0x140   :  { %1571 = vmatmul.msk.f32.vlgmr.msra.gmra.mxu3 %vm319_vm1, %v271_v24 }
 0x141   :  { %v239_v41 = vpop.trf.xlu1 }
 0x142   :  { %549 = vmatpush.msrb.mxu0 %v239_v41 }
 0x147   :  { %v272_v27 = vpop.trf.xlu0 }
 0x148   :  { %1572 = vmatmul.msk.f32.gmra.mxu3 %vm319_vm1, %v272_v27 }
 0x149   :  { %v240_v42 = vpop.trf.xlu1 }
 0x14a   :  { %572 = vmatpush.msrb.mxu1 %v240_v42 }
 0x14f   :  { %v273_v28 = vpop.trf.xlu0 }
 0x150   :  { %1573 = vmatmul.msk.f32.gmra.mxu3 %vm319_vm1, %v273_v28 }
 0x151   :  { %v241_v48 = vpop.trf.xlu1 }
 0x152   :  { %595 = vmatpush.msrb.mxu2 %v241_v48 }
 0x157   :  { %v274_v29 = vpop.trf.xlu0 }
 0x158   :  { %1574 = vmatmul.msk.f32.gmra.mxu3 %vm319_vm1, %v274_v29 }
 0x159   :  { %v242_v51 = vpop.trf.xlu1 }
 0x15a   :  { %618 = vmatpush.msra.mxu0 %v242_v51 }
 0x1c3   :  { %v349_v32 = vpop.f32.mrf.mxu3 }
 0x1c4   :  { %402 = vxpose.xlu0.b32.start.end [1/1] (short) (narrow) %v349_v32, 8 }
 0x1cb   :  { %v352_v33 = vpop.f32.mrf.mxu3 }
 0x1cc   :  { %434 = vxpose.xlu2.b32.start.end [1/1] (short) (narrow) %v352_v33, 8  ;;  %913 = vxpose.xlu0.b32.start [1/2] (short) (narrow) %v179_v44, 32 }
 0x1d3   :  { %v355_v37 = vpop.f32.mrf.mxu3 }
 0x1d4   :  { %287 = vxpose.xlu2.b32.start [1/2] (short) (narrow) %v210_v36, 32  ;;  %914 = vxpose.xlu0.b32.end [2/2] (short) (narrow) %v182_v46, 32 }
 0x1db   :  { %v358_v40 = vpop.f32.mrf.mxu3 }
 0x1dc   :  { %288 = vxpose.xlu2.b32.end [2/2] (short) (narrow) %v213_v39, 32  ;;  %498 = vxpose.xlu1.b32.start.end [1/1] (short) (narrow) %v358_v40, 8 }
 0x1e4   :  { %881 = vxpose.xlu1.b32.start [1/2] (short) (narrow) %v142_v53, 32 }
 0x1ec   :  { %882 = vxpose.xlu1.b32.end [2/2] (short) (narrow) %v145_v56, 32 }
 0x1f4   :  { %466 = vxpose.xlu2.b32.start.end [1/1] (short) (narrow) %v355_v37, 8 }
 0x265   :  { %v450_v47 = vpop.trf.xlu2 }
 0x266   :  { %1580 = vmatmul.msk.f32.vlgmr.msrb.gmra.mxu1 %vm530_vm2, %v450_v47 }
 0x268   :  { %v418_v49 = vpop.trf.xlu0 }
 0x269   :  { %1579 = vmatmul.msk.f32.vlgmr.msrb.gmra.mxu0 %vm530_vm2, %v418_v49 }
 0x26d   :  { %v303_v50 = vpop.trf.xlu2 }
 0x26e   :  { %1575 = vmatmul.msk.f32.vlgmr.msrb.gmra.mxu3 %vm319_vm1, %v303_v50  ;;  %v1917_v50 = vpop.f32.mrf.mxu2 }
 0x275   :  { %v304_v54 = vpop.trf.xlu2 }
 0x276   :  { %1576 = vmatmul.msk.f32.gmra.mxu3 %vm319_vm1, %v304_v54 }
 0x27d   :  { %v305_v57 = vpop.trf.xlu2 }
 0x27e   :  { %1577 = vmatmul.msk.f32.gmra.mxu3 %vm319_vm1, %v305_v57 }
 0x280   :  { %v514_v58 = vpop.trf.xlu1 }
 0x281   :  { %1582 = vmatmul.msk.f32.vlgmr.msra.gmra.mxu0 %vm530_vm2, %v514_v58 }
 0x285   :  { %v306_v59 = vpop.trf.xlu2 }
 0x286   :  { %1578 = vmatmul.msk.f32.gmra.mxu3 %vm319_vm1, %v306_v59 }
 0x28d   :  { %v482_v60 = vpop.trf.xlu2 }
 0x28e   :  { %1581 = vmatmul.msk.f32.vlgmr.msrb.gmra.mxu2 %vm530_vm2, %v482_v60 }
 0x2e3   :  { %v574_v61 = vpop.f32.mrf.mxu1 }
 0x2e4   :  { %v624_v62 = vmul.f32 0.35355338, %v574_v61 }
 0x2e6   :  { %v634_v63 = vsel %vm319_vm1, %v624_v62, -inf  ;;  %v551_v0 = vpop.f32.mrf.mxu0 }
 0x2e7   :  { %v635_v1 = vrot.slane %v634_v63, 4  ;;  %v623_v2 = vmul.f32 0.35355338, %v551_v0  ;;  %v1920_v0 = vpop.f32.mrf.mxu2 }
 0x2e9   :  { %v636_v3 = vmax.f32 %v634_v63, %v635_v1  ;;  %v627_v4 = vsel %vm319_vm1, %v623_v2, -inf }
 0x2ea   :  { %v628_v5 = vrot.slane %v627_v4, 4 }
 0x2eb   :  { %v637_v6 = vrot.slane %v636_v3, 2 }
 0x2ec   :  { %v629_v7 = vmax.f32 %v627_v4, %v628_v5 }
 0x2ed   :  { %v638_v10 = vmax.f32 %v636_v3, %v637_v6 }
 0x2ee   :  { %v630_v11 = vrot.slane %v629_v7, 2 }
 0x2ef   :  { %v639_v12 = vrot.slane %v638_v10, 1 }
 0x2f0   :  { %v631_v13 = vmax.f32 %v629_v7, %v630_v11 }
 0x2f1   :  { %v640_v14 = vmax.f32 %v638_v10, %v639_v12  ;;  %v390_v39 = vpop.f32.mrf.mxu3 }
 0x2f2   :  { %v632_v15 = vrot.slane %v631_v13, 1 }
 0x2f3   :  { %v656_v16 = vsub.f32 %v624_v62, %v640_v14  ;;  %v929_v62 = vpop.trf.xlu0 }
 0x2f4   :  { %v633_v17 = vmax.f32 %v631_v13, %v632_v15 }
 0x2f5   :  { %v661_v18 = vmul.f32 1.442695, %v656_v16 }
 0x2f6   :  { %v655_v19 = vsub.f32 %v623_v2, %v633_v17 }
 0x2f7   :  { %1614 = vpow2.f32 %v661_v18 }
 0x2f8   :  { %v659_v20 = vmul.f32 1.442695, %v655_v19 }
 0x2f9   :  { %v393_v58 = vpop.f32.mrf.mxu3 }
 0x2fa   :  { %1616 = vpow2.f32 %v659_v20 }
 0x2fb   :  { %v930_v2 = vpop.trf.xlu0 }
 0x2fd   :  { %v1615_v21 = vpop.eup %1614 }
 0x2fe   :  { %v674_v22 = vsel %vm319_vm1, %v1615_v21, 0.0  ;;  %v620_v10 = vpop.f32.mrf.mxu0 }
 0x2ff   :  { %v675_v23 = vrot.slane %v674_v22, 4  ;;  %v626_v11 = vmul.f32 0.35355338, %v620_v10 }
 0x300   :  { %v1617_v24 = vpop.eup %1616 }
 0x301   :  { %v676_v25 = vadd.f32 %v675_v23, %v674_v22  ;;  %v667_v26 = vsel %vm319_vm1, %v1617_v24, 0.0  ;;  %v648_v14 = vsel %vm319_vm1, %v626_v11, -inf }
 0x302   :  { %v668_v27 = vrot.slane %v667_v26, 4  ;;  %v649_v16 = vrot.slane %v648_v14, 4 }
 0x303   :  { %v677_v28 = vrot.slane %v676_v25, 2  ;;  %v931_v13 = vpop.trf.xlu0 }
 0x304   :  { %v669_v29 = vadd.f32 %v668_v27, %v667_v26  ;;  %v650_v18 = vmax.f32 %v648_v14, %v649_v16  ;;  %v897_v14 = vpop.trf.xlu1 }
 0x305   :  { %v678_v30 = vadd.f32 %v677_v28, %v676_v25 }
 0x306   :  { %v670_v31 = vrot.slane %v669_v29, 2  ;;  %v651_v20 = vrot.slane %v650_v18, 2 }
 0x307   :  { %v679_v32 = vrot.slane %v678_v30, 1 }
 0x308   :  { %v671_v33 = vadd.f32 %v670_v31, %v669_v29  ;;  %v652_v22 = vmax.f32 %v650_v18, %v651_v20 }
 0x309   :  { %v680_v34 = vadd.f32 %v679_v32, %v678_v30 }
 0x30a   :  { %v672_v36 = vrot.slane %v671_v33, 1  ;;  %v653_v23 = vrot.slane %v652_v22, 1 }
 0x30b   :  { %1618 = vrcp.f32 %v680_v34  ;;  %v721_v43 = vand.u32 2147483648, %v680_v34  ;;  %v719_v46 = vand.u32 2147483647, %v680_v34  ;;  %vm715_vm6 = vweird.f32 %v680_v34 }
 0x30c   :  { %v673_v37 = vadd.f32 %v672_v36, %v671_v33  ;;  %v654_v25 = vmax.f32 %v652_v22, %v653_v23  ;;  %v898_v16 = vpop.trf.xlu1 }
 0x30d   :  { %v722_v52 = vor.u32 1.1754944e-38, %v721_v43  ;;  %vm720_vm8 = vcmp.eq.f32.partialorder %v719_v46, 8.507059e+37  ;;  %1228 = vmatpush.msra.mxu3 %v898_v16 }
 0x30e   :  { %1620 = vrcp.f32 %v673_v37  ;;  %v706_v47 = vand.u32 2147483648, %v673_v37  ;;  %vm700_vm4 = vweird.f32 %v673_v37  ;;  %v704_v49 = vand.u32 2147483647, %v673_v37 }
 0x30f   :  { %v658_v26 = vsub.f32 %v626_v11, %v654_v25 }
 0x310   :  { %v707_v55 = vor.u32 1.1754944e-38, %v706_v47  ;;  %vm705_vm10 = vcmp.eq.f32.partialorder %v704_v49, 8.507059e+37 }
 0x311   :  { %v1619_v38 = vpop.eup %1618  ;;  %v597_v1 = vpop.f32.mrf.mxu2  ;;  %v665_v28 = vmul.f32 1.442695, %v658_v26 }
 0x312   :  { %v711_v40 = vmul.f32 %v1619_v38, %v680_v34  ;;  %vm716_vm3 = vweird.f32 %v1619_v38  ;;  %v625_v3 = vmul.f32 0.35355338, %v597_v1 }
 0x313   :  { %vm717_vm7 = vmor %vm715_vm6, %vm716_vm3 }
 0x314   :  { %v1621_v41 = vpop.eup %1620  ;;  %v712_v42 = vsub.f32 1.0, %v711_v40  ;;  %v641_v4 = vsel %vm319_vm1, %v625_v3, -inf }
 0x315   :  { %v696_v44 = vmul.f32 %v1621_v41, %v673_v37  ;;  %vm701_vm5 = vweird.f32 %v1621_v41  ;;  %v642_v5 = vrot.slane %v641_v4, 4 }
 0x316   :  { %v713_v45 = vmul.f32 %v1619_v38, %v712_v42  ;;  %vm702_vm9 = vmor %vm700_vm4, %vm701_vm5 }
 0x317   :  { %v697_v48 = vsub.f32 1.0, %v696_v44  ;;  %v643_v6 = vmax.f32 %v641_v4, %v642_v5 }
 0x318   :  { %v714_v51 = vadd.f32 %v1619_v38, %v713_v45 }
 0x319   :  { %v698_v53 = vmul.f32 %v1621_v41, %v697_v48  ;;  %v644_v7 = vrot.slane %v643_v6, 2 }
 0x31a   :  { %v718_v54 = vsel %vm717_vm7, %v1619_v38, %v714_v51 }
 0x31b   :  { %v723_v56 = vsel %vm720_vm8, %v722_v52, %v718_v54  ;;  %v699_v57 = vadd.f32 %v1621_v41, %v698_v53  ;;  %v645_v12 = vmax.f32 %v643_v6, %v644_v7 }
 0x31c   :  { %v724_v59 = vmul.f32 %v1615_v21, %v723_v56 }
 0x31d   :  { %v703_v60 = vsel %vm702_vm9, %v1621_v41, %v699_v57  ;;  %v646_v15 = vrot.slane %v645_v12, 1 }
 0x31e   :  { %796 = vmatpush.msra.mxu2 %v724_v59  ;;  %v708_v61 = vsel %vm705_vm10, %v707_v55, %v703_v60  ;;  %v396_v55 = vpop.f32.mrf.mxu3 }
 0x31f   :  { %1584 = vmatmul.msk.f32.vlgmr.msra.gmra.mxu2 %vm530_vm2, %v393_v58  ;;  %v709_v63 = vmul.f32 %v1617_v24, %v708_v61  ;;  %v647_v17 = vmax.f32 %v645_v12, %v646_v15  ;;  %v932_v24 = vpop.trf.xlu0 }
 0x320   :  { %1003 = vmatpush.msrb.mxu2 %v1855_v8 }
 0x321   :  { %773 = vmatpush.msra.mxu1 %v709_v63  ;;  %v657_v19 = vsub.f32 %v625_v3, %v647_v17  ;;  %v899_v17 = vpop.trf.xlu1 }
 0x322   :  { %1583 = vmatmul.msk.f32.vlgmr.msra.gmra.mxu1 %vm530_vm2, %v390_v39  ;;  %1004 = vmatpush.msrb.mxu2 %v1860_v9 }
 0x323   :  { %v663_v21 = vmul.f32 1.442695, %v657_v19 }
 0x325   :  { %1622 = vpow2.f32 %v663_v21 }
 0x326   :  { %1624 = vpow2.f32 %v665_v28  ;;  %v399_v5 = vpop.f32.mrf.mxu3 }
 0x327   :  { %1587 = vmatmul.msk.f32.vlgmr.msrb.gmra.mxu2 %vm319_vm1, %v929_v62 }
 0x329   :  { %v900_v19 = vpop.trf.xlu1 }
 0x32a   :  { %1274 = vmatpush.msrb.mxu3 %v900_v19 }
 0x32b   :  { %v1623_v27 = vpop.eup %1622 }
 0x32c   :  { %v681_v29 = vsel %vm319_vm1, %v1623_v27, 0.0  ;;  %v1625_v33 = vpop.eup %1624 }
 0x32d   :  { %v682_v30 = vrot.slane %v681_v29, 4  ;;  %v688_v36 = vsel %vm319_vm1, %v1625_v33, 0.0 }
 0x32e   :  { %v689_v38 = vrot.slane %v688_v36, 4 }
 0x32f   :  { %1588 = vmatmul.msk.f32.gmra.mxu2 %vm319_vm1, %v930_v2  ;;  %v683_v31 = vadd.f32 %v682_v30, %v681_v29 }
 0x330   :  { %v690_v40 = vadd.f32 %v689_v38, %v688_v36 }
 0x331   :  { %v684_v32 = vrot.slane %v683_v31, 2 }
 0x332   :  { %v691_v41 = vrot.slane %v690_v40, 2 }
 0x333   :  { %v685_v34 = vadd.f32 %v684_v32, %v683_v31 }
 0x334   :  { %v692_v42 = vadd.f32 %v691_v41, %v690_v40 }
 0x335   :  { %v686_v37 = vrot.slane %v685_v34, 1 }
 0x336   :  { %v693_v43 = vrot.slane %v692_v42, 1 }
 0x337   :  { %1589 = vmatmul.msk.f32.gmra.mxu2 %vm319_vm1, %v931_v13  ;;  %v687_v39 = vadd.f32 %v686_v37, %v685_v34  ;;  %v216_v13 = vadd.f32 %v1897_v35, %v1917_v50 }
 0x338   :  { %v694_v45 = vadd.f32 %v693_v43, %v692_v42 }
 0x339   :  { %1626 = vrcp.f32 %v687_v39  ;;  %v736_v47 = vand.u32 2147483648, %v687_v39  ;;  %vm730_vm11 = vweird.f32 %v687_v39  ;;  %v734_v49 = vand.u32 2147483647, %v687_v39 }
 0x33a   :  { %1628 = vrcp.f32 %v694_v45  ;;  %vm745_vm15 = vweird.f32 %v694_v45  ;;  %v751_v59 = vand.u32 2147483648, %v694_v45  ;;  %v749_v62 = vand.u32 2147483647, %v694_v45 }
 0x33b   :  { %v737_v52 = vor.u32 1.1754944e-38, %v736_v47  ;;  %vm735_vm14 = vcmp.eq.f32.partialorder %v734_v49, 8.507059e+37 }
 0x33c   :  { %v752_v1 = vor.u32 1.1754944e-38, %v751_v59  ;;  %vm750_vm5 = vcmp.eq.f32.partialorder %v749_v62, 8.507059e+37 }
 0x33f   :  { %1590 = vmatmul.msk.f32.gmra.mxu2 %vm319_vm1, %v932_v24  ;;  %v1627_v44 = vpop.eup %1626 }
 0x340   :  { %v726_v46 = vmul.f32 %v1627_v44, %v687_v39  ;;  %vm731_vm12 = vweird.f32 %v1627_v44  ;;  %v1629_v54 = vpop.eup %1628 }
 0x341   :  { %vm732_vm13 = vmor %vm730_vm11, %vm731_vm12  ;;  %v741_v57 = vmul.f32 %v1629_v54, %v694_v45  ;;  %vm746_vm3 = vweird.f32 %v1629_v54 }
 0x342   :  { %v727_v48 = vsub.f32 1.0, %v726_v46  ;;  %vm747_vm4 = vmor %vm745_vm15, %vm746_vm3 }
 0x343   :  { %v742_v61 = vsub.f32 1.0, %v741_v57 }
 0x344   :  { %v728_v51 = vmul.f32 %v1627_v44, %v727_v48 }
 0x345   :  { %v743_v63 = vmul.f32 %v1629_v54, %v742_v61 }
 0x346   :  { %v729_v53 = vadd.f32 %v1627_v44, %v728_v51 }
 0x347   :  { %v744_v2 = vadd.f32 %v1629_v54, %v743_v63 }
 0x348   :  { %v733_v56 = vsel %vm732_vm13, %v1627_v44, %v729_v53 }
 0x349   :  { %v738_v58 = vsel %vm735_vm14, %v737_v52, %v733_v56  ;;  %v748_v3 = vsel %vm747_vm4, %v1629_v54, %v744_v2 }
 0x34a   :  { %v739_v60 = vmul.f32 %v1623_v27, %v738_v58  ;;  %v753_v4 = vsel %vm750_vm5, %v752_v1, %v748_v3 }
 0x34b   :  { %v754_v6 = vmul.f32 %v1625_v33, %v753_v4 }
 0x34c   :  { %819 = vmatpush.msrb.mxu0 %v739_v60 }
 0x34d   :  { %1585 = vmatmul.msk.f32.vlgmr.msrb.gmra.mxu0 %vm530_vm2, %v396_v55  ;;  %842 = vmatpush.msrb.mxu1 %v754_v6 }
 0x34e   :  { %1044 = vmatpush.msra.mxu0 %v1855_v8  ;;  %1586 = vmatmul.msk.f32.vlgmr.msrb.gmra.mxu1 %vm530_vm2, %v399_v5 }
 0x34f   :  { %1205 = vmatpush.msra.mxu1 %v897_v14 }
 0x350   :  { %1045 = vmatpush.msra.mxu0 %v1860_v9  ;;  %v219_v9 = vadd.f32 %v1897_v35, %v1920_v0 }
 0x351   :  { %1251 = vmatpush.msrb.mxu1 %v899_v17 }
 0x39f   :  { %v775_v15 = vpop.f32.mrf.mxu1 }
 0x3a2   :  { %v798_v7 = vpop.f32.mrf.mxu2 }
 0x3aa   :  { %v1006_v10 = vpop.f32.mrf.mxu2 }
 0x3ab   :  { %1059 = vxpose.xlu1.b32.start.end [1/1] (short) (narrow) %v1006_v10, 8 }
 0x3b2   :  { %v1009_v11 = vpop.f32.mrf.mxu2 }
 0x3b3   :  { %1091 = vxpose.xlu2.b32.start.end [1/1] (short) (narrow) %v1009_v11, 8 }
 0x3ba   :  { %v1012_v12 = vpop.f32.mrf.mxu2 }
 0x3bb   :  { %1123 = vxpose.xlu2.b32.start.end [1/1] (short) (narrow) %v1012_v12, 8 }
 0x3c2   :  { %v1015_v8 = vpop.f32.mrf.mxu2 }
 0x3c3   :  { %945 = vxpose.xlu2.b32.start [1/2] (short) (narrow) %v216_v13, 32  ;;  %1155 = vxpose.xlu0.b32.start.end [1/1] (short) (narrow) %v1015_v8, 8 }
 0x3ca   :  { %v821_v18 = vpop.f32.mrf.mxu0 }
 0x3cb   :  { %946 = vxpose.xlu2.b32.end [2/2] (short) (narrow) %v219_v9, 32  ;;  %847 = vxpose.xlu0.b32.start [1/4] (short) (narrow) %v775_v15, 16  ;;  %v844_v50 = vpop.f32.mrf.mxu1 }
 0x3d3   :  { %848 = vxpose.xlu0.b32.cont [2/4] (short) (narrow) %v798_v7, 16 }
 0x3db   :  { %849 = vxpose.xlu0.b32.cont [3/4] (short) (narrow) %v821_v18, 16 }
 0x3e3   :  { %850 = vxpose.xlu0.b32.end [4/4] (short) (narrow) %v844_v50, 16 }
 0x44c   :  { %v1107_v20 = vpop.trf.xlu2 }
 0x44d   :  { %1596 = vmatmul.msk.f32.vlgmr.msra.gmra.mxu3 %vm530_vm2, %v1107_v20 }
 0x44f   :  { %v1075_v35 = vpop.trf.xlu1 }
 0x450   :  { %1595 = vmatmul.msk.f32.vlgmr.msra.gmra.mxu1 %vm530_vm2, %v1075_v35 }
 0x454   :  { %v1139_v0 = vpop.trf.xlu2 }
 0x458   :  { %1597 = vmatmul.msk.f32.vlgmr.msrb.gmra.mxu1 %vm530_vm2, %v1139_v0 }
 0x45c   :  { %v961_v21 = vpop.trf.xlu2 }
 0x45d   :  { %1591 = vmatmul.msk.f32.vlgmr.msra.gmra.mxu0 %vm319_vm1, %v961_v21 }
 0x464   :  { %v962_v22 = vpop.trf.xlu2 }
 0x465   :  { %1592 = vmatmul.msk.f32.gmra.mxu0 %vm319_vm1, %v962_v22 }
 0x467   :  { %v1171_v23 = vpop.trf.xlu0 }
 0x468   :  { %1598 = vmatmul.msk.f32.vlgmr.msrb.gmra.mxu3 %vm530_vm2, %v1171_v23 }
 0x46c   :  { %v963_v24 = vpop.trf.xlu2 }
 0x46d   :  { %1593 = vmatmul.msk.f32.gmra.mxu0 %vm319_vm1, %v963_v24 }
 0x474   :  { %v964_v25 = vpop.trf.xlu2 }
 0x475   :  { %1594 = vmatmul.msk.f32.gmra.mxu0 %vm319_vm1, %v964_v25 }
 0x4cd   :  { %v1207_v26 = vpop.f32.mrf.mxu1 }
 0x4ce   :  { %v1279_v27 = vmul.f32 0.35355338, %v1207_v26 }
 0x4d0   :  { %v1283_v28 = vsel %vm319_vm1, %v1279_v27, -inf  ;;  %v1230_v29 = vpop.f32.mrf.mxu3 }
 0x4d1   :  { %v1284_v30 = vrot.slane %v1283_v28, 4  ;;  %v1280_v31 = vmul.f32 0.35355338, %v1230_v29 }
 0x4d3   :  { %v1285_v32 = vmax.f32 %v1283_v28, %v1284_v30  ;;  %v1290_v33 = vsel %vm319_vm1, %v1280_v31, -inf }
 0x4d4   :  { %v1291_v34 = vrot.slane %v1290_v33, 4 }
 0x4d5   :  { %v1286_v36 = vrot.slane %v1285_v32, 2  ;;  %v1253_v37 = vpop.f32.mrf.mxu1 }
 0x4d6   :  { %v1292_v38 = vmax.f32 %v1290_v33, %v1291_v34  ;;  %v1281_v39 = vmul.f32 0.35355338, %v1253_v37 }
 0x4d7   :  { %v1287_v40 = vmax.f32 %v1285_v32, %v1286_v36 }
 0x4d8   :  { %v1293_v41 = vrot.slane %v1292_v38, 2  ;;  %v1297_v42 = vsel %vm319_vm1, %v1281_v39, -inf }
 0x4d9   :  { %v1288_v43 = vrot.slane %v1287_v40, 1  ;;  %v1298_v44 = vrot.slane %v1297_v42, 4 }
 0x4da   :  { %v1294_v45 = vmax.f32 %v1292_v38, %v1293_v41 }
 0x4db   :  { %v1289_v46 = vmax.f32 %v1287_v40, %v1288_v43  ;;  %v1299_v47 = vmax.f32 %v1297_v42, %v1298_v44 }
 0x4dc   :  { %v1295_v48 = vrot.slane %v1294_v45, 1 }
 0x4dd   :  { %v1311_v49 = vsub.f32 %v1279_v27, %v1289_v46  ;;  %v1300_v51 = vrot.slane %v1299_v47, 2 }
 0x4de   :  { %v1296_v52 = vmax.f32 %v1294_v45, %v1295_v48 }
 0x4df   :  { %v1315_v53 = vmul.f32 1.442695, %v1311_v49  ;;  %v1301_v54 = vmax.f32 %v1299_v47, %v1300_v51 }
 0x4e0   :  { %v1312_v55 = vsub.f32 %v1280_v31, %v1296_v52  ;;  %v1047_v31 = vpop.f32.mrf.mxu0 }
 0x4e1   :  { %1630 = vpow2.f32 %v1315_v53  ;;  %v1302_v56 = vrot.slane %v1301_v54, 1 }
 0x4e2   :  { %v1317_v57 = vmul.f32 1.442695, %v1312_v55 }
 0x4e3   :  { %v1303_v58 = vmax.f32 %v1301_v54, %v1302_v56 }
 0x4e4   :  { %1632 = vpow2.f32 %v1317_v57 }
 0x4e5   :  { %v1313_v59 = vsub.f32 %v1281_v39, %v1303_v58 }
 0x4e7   :  { %v1952_v60 = vpop.eup %1630  ;;  %v1319_v61 = vmul.f32 1.442695, %v1313_v59 }
 0x4e8   :  { %v1323_v62 = vsel %vm319_vm1, %v1952_v60, 0.0  ;;  %v1050_v57 = vpop.f32.mrf.mxu0 }
 0x4e9   :  { %v1324_v63 = vrot.slane %v1323_v62, 4  ;;  %1634 = vpow2.f32 %v1319_v61 }
 0x4ea   :  { %v1956_v1 = vpop.eup %1632 }
 0x4eb   :  { %v1325_v2 = vadd.f32 %v1324_v63, %v1323_v62  ;;  %v1330_v3 = vsel %vm319_vm1, %v1956_v1, 0.0  ;;  %v1276_v4 = vpop.f32.mrf.mxu3 }
 0x4ec   :  { %v1331_v5 = vrot.slane %v1330_v3, 4  ;;  %v1282_v6 = vmul.f32 0.35355338, %v1276_v4 }
 0x4ed   :  { %v1326_v7 = vrot.slane %v1325_v2, 2 }
 0x4ee   :  { %v1332_v10 = vadd.f32 %v1331_v5, %v1330_v3  ;;  %v1304_v11 = vsel %vm319_vm1, %v1282_v6, -inf }
 0x4ef   :  { %v1961_v12 = vpop.eup %1634  ;;  %v1327_v13 = vadd.f32 %v1326_v7, %v1325_v2  ;;  %v1305_v8 = vrot.slane %v1304_v11, 4 }
 0x4f0   :  { %v1333_v9 = vrot.slane %v1332_v10, 2  ;;  %v1337_v14 = vsel %vm319_vm1, %v1961_v12, 0.0 }
 0x4f1   :  { %v1328_v15 = vrot.slane %v1327_v13, 1  ;;  %v1338_v16 = vrot.slane %v1337_v14, 4  ;;  %v1306_v17 = vmax.f32 %v1304_v11, %v1305_v8  ;;  %v1053_v8 = vpop.f32.mrf.mxu0 }
 0x4f2   :  { %v1334_v18 = vadd.f32 %v1333_v9, %v1332_v10 }
 0x4f3   :  { %v1329_v19 = vadd.f32 %v1328_v15, %v1327_v13  ;;  %v1339_v50 = vadd.f32 %v1338_v16, %v1337_v14  ;;  %v1307_v20 = vrot.slane %v1306_v17, 2 }
 0x4f4   :  { %v1335_v35 = vrot.slane %v1334_v18, 1 }
 0x4f5   :  { %1636 = vrcp.f32 %v1329_v19  ;;  %v1340_v0 = vrot.slane %v1339_v50, 2  ;;  %v1308_v21 = vmax.f32 %v1306_v17, %v1307_v20  ;;  %v1362_v36 = vand.u32 2147483648, %v1329_v19 }
 0x4f6   :  { %v1336_v22 = vadd.f32 %v1335_v35, %v1334_v18  ;;  %v1360_v39 = vand.u32 2147483647, %v1329_v19  ;;  %vm1356_vm7 = vweird.f32 %v1329_v19 }
 0x4f7   :  { %v1341_v23 = vadd.f32 %v1340_v0, %v1339_v50  ;;  %v1309_v24 = vrot.slane %v1308_v21, 1  ;;  %v1363_v44 = vor.u32 1.1754944e-38, %v1362_v36 }
 0x4f8   :  { %1638 = vrcp.f32 %v1336_v22  ;;  %v1377_v42 = vand.u32 2147483648, %v1336_v22  ;;  %v1375_v46 = vand.u32 2147483647, %v1336_v22  ;;  %vm1361_vm10 = vcmp.eq.f32.partialorder %v1360_v39, 8.507059e+37 }
 0x4f9   :  { %v1342_v25 = vrot.slane %v1341_v23, 1  ;;  %v1310_v26 = vmax.f32 %v1308_v21, %v1309_v24  ;;  %vm1371_vm11 = vweird.f32 %v1336_v22  ;;  %v1056_v21 = vpop.f32.mrf.mxu0 }
 0x4fa   :  { %v1378_v55 = vor.u32 1.1754944e-38, %v1377_v42  ;;  %vm1376_vm13 = vcmp.eq.f32.partialorder %v1375_v46, 8.507059e+37 }
 0x4fb   :  { %v1637_v27 = vpop.eup %1636  ;;  %v1343_v28 = vadd.f32 %v1342_v25, %v1341_v23  ;;  %v1314_v29 = vsub.f32 %v1282_v6, %v1310_v26  ;;  %v863_v23 = vpop.trf.xlu0 }
 0x4fc   :  { %v1352_v30 = vmul.f32 %v1637_v27, %v1329_v19  ;;  %vm1357_vm6 = vweird.f32 %v1637_v27  ;;  %879 = vst.msk [vmem:[#allocation10] sm:$0xff] %vm105_vm0, %v863_v23 }
 0x4fd   :  { %1640 = vrcp.f32 %v1343_v28  ;;  %v1321_v32 = vmul.f32 1.442695, %v1314_v29  ;;  %vm1358_vm8 = vmor %vm1356_vm7, %vm1357_vm6  ;;  %v1392_v61 = vand.u32 2147483648, %v1343_v28  ;;  %v1390_v2 = vand.u32 2147483647, %v1343_v28 }
 0x4fe   :  { %v1639_v33 = vpop.eup %1638  ;;  %v1353_v34 = vsub.f32 1.0, %v1352_v30 }
 0x4ff   :  { %1642 = vpow2.f32 %v1321_v32  ;;  %v1367_v37 = vmul.f32 %v1639_v33, %v1336_v22  ;;  %vm1372_vm9 = vweird.f32 %v1639_v33  ;;  %v1393_v6 = vor.u32 1.1754944e-38, %v1392_v61 }
 0x500   :  { %v1354_v38 = vmul.f32 %v1637_v27, %v1353_v34  ;;  %vm1373_vm12 = vmor %vm1371_vm11, %vm1372_vm9  ;;  %vm1391_vm3 = vcmp.eq.f32.partialorder %v1390_v2, 8.507059e+37 }
 0x501   :  { %v1368_v40 = vsub.f32 1.0, %v1367_v37 }
 0x502   :  { %v1355_v41 = vadd.f32 %v1637_v27, %v1354_v38 }
 0x503   :  { %v1641_v43 = vpop.eup %1640  ;;  %v1369_v45 = vmul.f32 %v1639_v33, %v1368_v40 }
 0x504   :  { %v1359_v47 = vsel %vm1358_vm8, %v1637_v27, %v1355_v41  ;;  %v1382_v48 = vmul.f32 %v1641_v43, %v1343_v28  ;;  %vm1387_vm14 = vweird.f32 %v1641_v43  ;;  %v864_v27 = vpop.trf.xlu0 }
 0x505   :  { %v1643_v49 = vpop.eup %1642  ;;  %v1364_v51 = vsel %vm1361_vm10, %v1363_v44, %v1359_v47  ;;  %v1370_v52 = vadd.f32 %v1639_v33, %v1369_v45  ;;  %880 = vst.msk [vmem:[#allocation10 + $0x8] sm:$0xff] %vm105_vm0, %v864_v27 }
 0x506   :  { %v1344_v53 = vsel %vm319_vm1, %v1643_v49, 0.0  ;;  %v1365_v54 = vmul.f32 %v1952_v60, %v1364_v51  ;;  %v1383_v56 = vsub.f32 1.0, %v1382_v48  ;;  %vm1386_vm1 = vweird.f32 %v1343_v28 }
 0x507   :  { %v1345_v58 = vrot.slane %v1344_v53, 4  ;;  %v1374_v59 = vsel %vm1373_vm12, %v1639_v33, %v1370_v52  ;;  %vm1388_vm15 = vmor %vm1386_vm1, %vm1387_vm14 }
 0x508   :  { %1429 = vmatpush.msra.mxu1 %v1365_v54  ;;  %v1379_v62 = vsel %vm1376_vm13, %v1378_v55, %v1374_v59  ;;  %v1384_v63 = vmul.f32 %v1641_v43, %v1383_v56 }
 0x509   :  { %v1346_v3 = vadd.f32 %v1345_v58, %v1344_v53  ;;  %v1380_v4 = vmul.f32 %v1956_v1, %v1379_v62  ;;  %1599 = vmatmul.msk.f32.vlgmr.msra.gmra.mxu1 %vm530_vm2, %v1047_v31 }
 0x50a   :  { %v1385_v5 = vadd.f32 %v1641_v43, %v1384_v63 }
 0x50b   :  { %v1347_v60 = vrot.slane %v1346_v3, 2  ;;  %1452 = vmatpush.msra.mxu3 %v1380_v4 }
 0x50c   :  { %v1389_v7 = vsel %vm1388_vm15, %v1641_v43, %v1385_v5  ;;  %1600 = vmatmul.msk.f32.vlgmr.msra.gmra.mxu3 %vm530_vm2, %v1050_v57 }
 0x50d   :  { %v1348_v10 = vadd.f32 %v1347_v60, %v1346_v3  ;;  %v1394_v11 = vsel %vm1391_vm3, %v1393_v6, %v1389_v7 }
 0x50e   :  { %v1395_v13 = vmul.f32 %v1961_v12, %v1394_v11 }
 0x50f   :  { %v1349_v9 = vrot.slane %v1348_v10, 1 }
 0x510   :  { %1475 = vmatpush.msrb.mxu1 %v1395_v13 }
 0x511   :  { %v1350_v1 = vadd.f32 %v1349_v9, %v1348_v10  ;;  %1601 = vmatmul.msk.f32.vlgmr.msrb.gmra.mxu1 %vm530_vm2, %v1053_v8 }
 0x513   :  { %1644 = vrcp.f32 %v1350_v1  ;;  %v1407_v17 = vand.u32 2147483648, %v1350_v1  ;;  %v1405_v19 = vand.u32 2147483647, %v1350_v1  ;;  %vm1401_vm5 = vweird.f32 %v1350_v1 }
 0x515   :  { %v1408_v20 = vor.u32 1.1754944e-38, %v1407_v17  ;;  %vm1406_vm7 = vcmp.eq.f32.partialorder %v1405_v19, 8.507059e+37 }
 0x519   :  { %v1645_v14 = vpop.eup %1644 }
 0x51a   :  { %v1397_v15 = vmul.f32 %v1645_v14, %v1350_v1  ;;  %vm1402_vm4 = vweird.f32 %v1645_v14 }
 0x51b   :  { %vm1403_vm6 = vmor %vm1401_vm5, %vm1402_vm4 }
 0x51c   :  { %v1398_v16 = vsub.f32 1.0, %v1397_v15 }
 0x51e   :  { %v1399_v18 = vmul.f32 %v1645_v14, %v1398_v16 }
 0x520   :  { %v1400_v50 = vadd.f32 %v1645_v14, %v1399_v18 }
 0x522   :  { %v1404_v35 = vsel %vm1403_vm6, %v1645_v14, %v1400_v50 }
 0x523   :  { %v1409_v12 = vsel %vm1406_vm7, %v1408_v20, %v1404_v35 }
 0x524   :  { %v1410_v0 = vmul.f32 %v1643_v49, %v1409_v12 }
 0x526   :  { %1498 = vmatpush.msra.mxu2 %v1410_v0 }
 0x527   :  { %1602 = vmatmul.msk.f32.vlgmr.msra.gmra.mxu2 %vm530_vm2, %v1056_v21 }
 0x586   :  { %v1431_v22 = vpop.f32.mrf.mxu1 }
 0x587   :  { %1503 = vxpose.xlu1.b32.start [1/4] (short) (narrow) %v1431_v22, 16 }
 0x58e   :  { %v1477_v25 = vpop.f32.mrf.mxu1 }
 0x58f   :  { %v1454_v24 = vpop.f32.mrf.mxu3 }
 0x590   :  { %1504 = vxpose.xlu1.b32.cont [2/4] (short) (narrow) %v1454_v24, 16 }
 0x598   :  { %1505 = vxpose.xlu1.b32.cont [3/4] (short) (narrow) %v1477_v25, 16 }
 0x5aa   :  { %v1500_v26 = vpop.f32.mrf.mxu2 }
 0x5ab   :  { %1506 = vxpose.xlu1.b32.end [4/4] (short) (narrow) %v1500_v26, 16 }
 0x637   :  { %v1519_v28 = vpop.trf.xlu1 }
 0x638   :  { %1536 = vst.msk [vmem:[#allocation10 + $0x10] sm:$0xff] %vm105_vm0, %v1519_v28 }
 0x63f   :  { %v1520_v29 = vpop.trf.xlu1 }
 0x640   :  { %1537 = vst.msk [vmem:[#allocation10 + $0x18] sm:$0xff] %vm105_vm0, %v1520_v29 }
 0x641   :  { %1550 = dma.vmem_to_hbm [thread:$0]  %s1543_s30, 512, %s1545_s11, [#allocation4], %s1775_s13, %s1775_s13, %s1776_s14  }
 0x642   :  { %1772 = dma.done.wait [#allocation4], 512  }
 0x643   :  { %1773 = vsyncadd [#allocation4], 4294966784 }
 0x644   :  { %1555 = vsyncpa [#allocation3], 1 }
 0x645   :  { %1556 = vsyncpa [#allocation6], 1 }
 0x646   :  { %1557 = vsyncpa [#allocation9], 1 }
 0x647   :  { %1558 = vsyncpa [#allocation4], 1 }

</bundles_post_ra>
